<compile_context>
chip_gen: v7x
topology: tpu7x:2x2x1
jax: 0.10.0
libtpu: 0.0.40
codegen_flags: <defaults>
</compile_context>

<pallas_src>
import functools

import jax
import jax.numpy as jnp
from jax.experimental import pallas as pl
from jax.experimental.pallas import tpu as pltpu


def _pick_lane_tile(n, cap):
    """Tile for a lane (last) dimension of size n.

    Small n -> single full-extent block (any size is legal for a full-dim
    block).  Larger n -> a multiple of 128, capped at `cap`, chosen so the grid
    has >= 2 steps (so the "parallel" axis can shard across the two
    TensorCores on v7x).  Remainders are handled by a pl.cdiv grid: the OOB
    tail only feeds garbage into output columns whose stores are masked.
    """
    if n <= 256:
        return n
    return max(128, min(cap, ((n // 2) // 128) * 128))


# ----------------------------------------------------------------------------
# Pallas kernel 1: conv-as-matmul, transposed (lane-dense) orientation
#   out(Cout, M) = relu( W(Cout, K) @ P(K, M) + b(Cout, 1) )
# Grid = (M_tiles,) all "parallel"; full-K contraction, no accumulator scratch.
# ----------------------------------------------------------------------------
def _conv_matmul_kernel(w_ref, p_ref, b_ref, o_ref, *, apply_relu):
    acc = jnp.dot(w_ref[...], p_ref[...], preferred_element_type=jnp.float32)
    r = acc + b_ref[...]                       # (Cout, tm) + (Cout, 1), f32
    if apply_relu:
        r = jnp.maximum(r, 0.0)
    o_ref[...] = r.astype(o_ref.dtype)         # downcast only at the store


def conv_matmul_pallas(w2, p, b, *, apply_relu, out_dtype, tm_cap=2048):
    Cout, K = w2.shape
    K2, M = p.shape
    assert K == K2 and b.shape == (Cout, 1)
    tm = _pick_lane_tile(M, tm_cap)
    n_steps = pl.cdiv(M, tm)
    # Deeper buffering only on the single streamed operand (the patch matrix);
    # weights / bias have a constant block index so they are fetched once.
    p_kwargs = dict(pipeline_mode=pl.Buffered(3)) if n_steps >= 3 else {}
    out_bytes = jnp.dtype(out_dtype).itemsize
    cost = pl.CostEstimate(
        flops=2 * Cout * K * M,
        transcendentals=0,
        bytes_accessed=int(Cout * K * 2 + K * M * 2 + Cout * M * out_bytes + Cout * 4))
    return pl.pallas_call(
        functools.partial(_conv_matmul_kernel, apply_relu=apply_relu),
        out_shape=jax.ShapeDtypeStruct((Cout, M), out_dtype),
        grid_spec=pltpu.PrefetchScalarGridSpec(
            num_scalar_prefetch=0,
            grid=(n_steps,),
            in_specs=[
                pl.BlockSpec((Cout, K), lambda j: (0, 0)),             # weights, resident
                pl.BlockSpec((K, tm), lambda j: (0, j), **p_kwargs),   # patches, streamed
                pl.BlockSpec((Cout, 1), lambda j: (0, 0)),             # bias, resident
            ],
            out_specs=pl.BlockSpec((Cout, tm), lambda j: (0, j))),
        compiler_params=pltpu.CompilerParams(
            dimension_semantics=("parallel",),
            vmem_limit_bytes=48 * 1024 * 1024),   # <= v7x's 64 MiB physical
        cost_estimate=cost,
    )(w2, p, b)


# ----------------------------------------------------------------------------
# Pallas kernel 2: fused FC head, transposed orientation, batch-tiled grid
#   hidden(F, tb) = relu( W1(F, K) @ xT(K, tb) + b1(F, 1) )
#   out(A, tb)    = W2(A, F) @ hidden + b2(A, 1)
# ----------------------------------------------------------------------------
def _mlp_head_kernel(xt_ref, w1_ref, b1_ref, w2_ref, b2_ref, o_ref):
    h = jnp.dot(w1_ref[...], xt_ref[...], preferred_element_type=jnp.float32)
    h = jnp.maximum(h + b1_ref[...], 0.0)                  # fc1 bias + ReLU, f32
    o = jnp.dot(w2_ref[...], h.astype(jnp.bfloat16),       # fc2 on bf16 operands
                preferred_element_type=jnp.float32)        # ... f32 accumulate
    o_ref[...] = (o + b2_ref[...]).astype(o_ref.dtype)     # fc2 bias, f32


def mlp_head_pallas(xt, w1, b1, w2, b2, *, tb_cap=256):
    K, B = xt.shape
    F, K2 = w1.shape
    A, F2 = w2.shape
    assert K == K2 and F == F2
    assert b1.shape == (F, 1) and b2.shape == (A, 1)
    tb = _pick_lane_tile(B, tb_cap)
    grid = (pl.cdiv(B, tb),)
    return pl.pallas_call(
        _mlp_head_kernel,
        out_shape=jax.ShapeDtypeStruct((A, B), jnp.float32),
        grid_spec=pltpu.PrefetchScalarGridSpec(
            num_scalar_prefetch=0,
            grid=grid,
            in_specs=[
                pl.BlockSpec((K, tb), lambda j: (0, j)),   # flattened conv features (transposed)
                pl.BlockSpec((F, K), lambda j: (0, 0)),    # fc1 weight, resident (PyTorch layout)
                pl.BlockSpec((F, 1), lambda j: (0, 0)),    # fc1 bias
                pl.BlockSpec((A, F), lambda j: (0, 0)),    # fc2 weight, resident (bf16)
                pl.BlockSpec((A, 1), lambda j: (0, 0)),    # fc2 bias
            ],
            out_specs=pl.BlockSpec((A, tb), lambda j: (0, j))),
        compiler_params=pltpu.CompilerParams(
            dimension_semantics=("parallel",),
            vmem_limit_bytes=48 * 1024 * 1024),
    )(xt, w1, b1, w2, b2)


# ----------------------------------------------------------------------------
# Patch extraction glue (strided slicing, no advanced-index gather, no padding)
# ----------------------------------------------------------------------------
def _extract_patches(x_cbhw, k, s, *, spatial_major):
    """x: (C, B, H, W) -> (C*k*k, M).  Feature order (C, kh, kw) matches the
    PyTorch (Cout, Cin, kh, kw) weight reshape.  M order is (b, ho, wo) by
    default, or (ho, wo, b) with spatial_major=True."""
    C, B, H, W = x_cbhw.shape
    Ho = (H - k) // s + 1
    Wo = (W - k) // s + 1
    slices = []
    for kh in range(k):
        for kw in range(k):
            sl = x_cbhw[:, :, kh:kh + (Ho - 1) * s + 1:s,
                              kw:kw + (Wo - 1) * s + 1:s]      # (C, B, Ho, Wo)
            if spatial_major:
                sl = jnp.transpose(sl, (0, 2, 3, 1))           # (C, Ho, Wo, B)
            slices.append(sl)
    p = jnp.stack(slices, axis=1)                               # (C, k*k, ...)
    return p.reshape(C * k * k, B * Ho * Wo), Ho, Wo


def conv2d_relu_pallas(x_cbhw, w2, b, k, stride, *, spatial_major=False):
    """x: (Cin, B, H, W) bf16; w2: (Cout, Cin*k*k) bf16; b: (Cout, 1) f32.

    spatial_major=False -> (Cout, B, Ho, Wo): channel-major input for the next
    conv (free reshape of the (Cout, M) kernel output, no NCHW transpose).
    spatial_major=True  -> (Cout*Ho*Wo, B): the flattened conv features,
    transposed, in PyTorch's view(B, -1) feature order, fed straight to the
    FC head with no transpose / pad.
    """
    # TODO(synk): the (K, M) im2col matrix is still materialized once in HBM
    # (4-9x the activation size); folding patch extraction into the kernel via
    # manual strided DMAs from a pl.ANY-space input would remove that traffic.
    Cout, K = w2.shape
    C, B, H, W = x_cbhw.shape
    p, Ho, Wo = _extract_patches(x_cbhw, k, stride, spatial_major=spatial_major)
    assert p.shape[0] == K
    out = conv_matmul_pallas(w2, p, b, apply_relu=True, out_dtype=jnp.bfloat16)
    if spatial_major:
        return out.reshape(Cout * Ho * Wo, B)
    return out.reshape(Cout, B, Ho, Wo)


# ----------------------------------------------------------------------------
# NatureCNN parameters (PyTorch layout) + one-time kernel-layout preparation
# ----------------------------------------------------------------------------
def init_nature_cnn(key, state_shape, action_len=4, feature_dim=512):
    C, H, W = state_shape

    def conv_out(h, k, s):
        return (h - k) // s + 1

    h1, w1 = conv_out(H, 8, 4), conv_out(W, 8, 4)
    h2, w2 = conv_out(h1, 4, 2), conv_out(w1, 4, 2)
    h3, w3 = conv_out(h2, 3, 1), conv_out(w2, 3, 1)
    conv_out_dim = 64 * h3 * w3

    def uniform(k, shape, fan_in):
        bound = 1.0 / jnp.sqrt(jnp.float32(fan_in))
        return jax.random.uniform(k, shape, jnp.float32, -bound, bound)

    ks = jax.random.split(key, 10)
    return {
        "conv1_w": uniform(ks[0], (32, C, 8, 8), C * 8 * 8),
        "conv1_b": uniform(ks[1], (32,), C * 8 * 8),
        "conv2_w": uniform(ks[2], (64, 32, 4, 4), 32 * 4 * 4),
        "conv2_b": uniform(ks[3], (64,), 32 * 4 * 4),
        "conv3_w": uniform(ks[4], (64, 64, 3, 3), 64 * 3 * 3),
        "conv3_b": uniform(ks[5], (64,), 64 * 3 * 3),
        "fc1_w": uniform(ks[6], (feature_dim, conv_out_dim), conv_out_dim),
        "fc1_b": uniform(ks[7], (feature_dim,), conv_out_dim),
        "fc2_w": uniform(ks[8], (action_len, feature_dim), feature_dim),
        "fc2_b": uniform(ks[9], (action_len,), feature_dim),
    }


def prepare_params(params):
    """One-time transform into kernel-friendly layouts (no per-forward .T /
    reshape, and no zero-padding anywhere):
      - conv weights -> (Cout, Cin*k*k) bf16, conv biases -> (Cout, 1) f32
      - fc weights stay in PyTorch (out, in) orientation, cast to bf16, since
        the FC head runs transposed: hidden(F,B)=W1@xT, out(A,B)=W2@hidden.
    """
    def prep_conv(w, b):
        Cout = w.shape[0]
        return (w.reshape(Cout, -1).astype(jnp.bfloat16),
                b.reshape(Cout, 1).astype(jnp.float32))

    kp = {}
    kp["conv1_w"], kp["conv1_b"] = prep_conv(params["conv1_w"], params["conv1_b"])
    kp["conv2_w"], kp["conv2_b"] = prep_conv(params["conv2_w"], params["conv2_b"])
    kp["conv3_w"], kp["conv3_b"] = prep_conv(params["conv3_w"], params["conv3_b"])
    kp["fc1_w"] = params["fc1_w"].astype(jnp.bfloat16)                  # (F, K)
    kp["fc1_b"] = params["fc1_b"].reshape(-1, 1).astype(jnp.float32)    # (F, 1)
    kp["fc2_w"] = params["fc2_w"].astype(jnp.bfloat16)                  # (A, F)
    kp["fc2_b"] = params["fc2_b"].reshape(-1, 1).astype(jnp.float32)    # (A, 1)
    return kp


# ----------------------------------------------------------------------------
# Forward pass (non-dueling NatureCNN)
# ----------------------------------------------------------------------------
def nature_cnn_forward(kparams, state):
    if state.dtype == jnp.uint8:
        state = state.astype(jnp.float32) / 255.0
    # Channel-major (C, B, H, W) between conv layers: the transposed conv
    # matmul writes (Cout, M) lane-dense, so no per-layer NCHW transpose.
    x = jnp.transpose(state.astype(jnp.float32), (1, 0, 2, 3)).astype(jnp.bfloat16)
    x = conv2d_relu_pallas(x, kparams["conv1_w"], kparams["conv1_b"], 8, 4)
    x = conv2d_relu_pallas(x, kparams["conv2_w"], kparams["conv2_b"], 4, 2)
    # conv3 writes (Cout*h3*w3, B) directly (spatial-major M ordering) = the
    # PyTorch flatten, transposed: no XLA transpose/reshape/pad before the head.
    xt = conv2d_relu_pallas(x, kparams["conv3_w"], kparams["conv3_b"], 3, 1,
                            spatial_major=True)
    # TODO(synk): dueling head (adv/val streams) not implemented; it would be
    # the same fused-head kernel with an extra value column + combine epilogue.
    out_t = mlp_head_pallas(xt, kparams["fc1_w"], kparams["fc1_b"],
                            kparams["fc2_w"], kparams["fc2_b"])          # (A, B)
    return out_t.T                                                       # (B, A)


# ----------------------------------------------------------------------------
# Pure-JAX reference (f32) for correctness check
# ----------------------------------------------------------------------------
def nature_cnn_reference(params, state):
    x = state.astype(jnp.float32)

    def conv(x, w, b, s):
        y = jax.lax.conv_general_dilated(
            x, w, window_strides=(s, s), padding="VALID",
            dimension_numbers=("NCHW", "OIHW", "NCHW"))
        return jax.nn.relu(y + b[None, :, None, None])

    x = conv(x, params["conv1_w"], params["conv1_b"], 4)
    x = conv(x, params["conv2_w"], params["conv2_b"], 2)
    x = conv(x, params["conv3_w"], params["conv3_b"], 1)
    x = x.reshape(x.shape[0], -1)
    x = jax.nn.relu(x @ params["fc1_w"].T + params["fc1_b"])
    x = x @ params["fc2_w"].T + params["fc2_b"]
    return x


if __name__ == "__main__":
    # Small but conv-stack-consistent shapes: (B=2, C=4, H=W=36)
    #   conv1(k8,s4): 36 -> 8 ; conv2(k4,s2): 8 -> 3 ; conv3(k3,s1): 3 -> 1
    #   conv_out_dim = 64 ; feature_dim = 32 ; action_len = 4
    B, C, H, W = 2, 4, 36, 36
    feature_dim, action_len = 32, 4

    key = jax.random.PRNGKey(0)
    k_params, k_x = jax.random.split(key)
    params = init_nature_cnn(k_params, (C, H, W), action_len, feature_dim)
    kparams = prepare_params(params)
    x = jax.random.uniform(k_x, (B, C, H, W), jnp.float32)

    fwd = jax.jit(nature_cnn_forward)
    out = jax.block_until_ready(fwd(kparams, x))
    assert out.shape == (B, action_len), out.shape

    ref = jax.block_until_ready(nature_cnn_reference(params, x))
    # bf16 MXU operands with f32 accumulation -> compare at bf16-level tolerance.
    assert jnp.allclose(out, ref, atol=3e-2, rtol=3e-2), (out, ref)

    print("KERNEL_OK")
</pallas_src>

<mosaic_0001>
module attributes {stable_mosaic.version = 11 : i64} {
  func.func @_conv_matmul_kernel(%arg0: i32, %arg1: memref<32x256xbf16, #tpu.memory_space<vmem>>, %arg2: memref<256x128xbf16, #tpu.memory_space<vmem>>, %arg3: memref<32x1xf32, #tpu.memory_space<vmem>>, %arg4: memref<32x128xbf16, #tpu.memory_space<vmem>>) attributes {dimension_semantics = [#tpu.dimension_semantics<parallel>], iteration_bounds = array<i64: 1>, scalar_prefetch = 0 : i64, scratch_operands = 0 : i64, tpu.core_type = #tpu.core_type<tc>, window_params = [{pipeline_mode = #tpu.pipeline_mode<synchronous>, transform_indices = @transform_0, window_bounds = array<i64: 32, 256>}, {transform_indices = @transform_1, window_bounds = array<i64: 256, 128>}, {pipeline_mode = #tpu.pipeline_mode<synchronous>, transform_indices = @transform_2, window_bounds = array<i64: 32, 1>}, {transform_indices = @transform_3, window_bounds = array<i64: 32, 128>}]} {
    %c0 = arith.constant 0 : index
    %c0_0 = arith.constant 0 : index
    %0 = vector.load %arg1[%c0, %c0_0] : memref<32x256xbf16, #tpu.memory_space<vmem>>, vector<32x256xbf16>
    %c0_1 = arith.constant 0 : index
    %c0_2 = arith.constant 0 : index
    %1 = vector.load %arg2[%c0_1, %c0_2] : memref<256x128xbf16, #tpu.memory_space<vmem>>, vector<256x128xbf16>
    %cst = arith.constant dense<0.000000e+00> : vector<32x128xf32>
    %2 = tpu.matmul %0, %1, %cst {dimension_numbers = #tpu.dot_dimension_numbers<[1], [0], [0], [1], [0, 0, 1, 1], [], []>} : vector<32x256xbf16>, vector<256x128xbf16>, vector<32x128xf32> -> vector<32x128xf32>
    %c0_3 = arith.constant 0 : index
    %c0_4 = arith.constant 0 : index
    %3 = vector.load %arg3[%c0_3, %c0_4] : memref<32x1xf32, #tpu.memory_space<vmem>>, vector<32x1xf32>
    %4 = vector.broadcast %3 : vector<32x1xf32> to vector<32x128xf32>
    %5 = arith.addf %2, %4 : vector<32x128xf32>
    %cst_5 = arith.constant 0.000000e+00 : f32
    %6 = vector.broadcast %cst_5 : f32 to vector<32x128xf32>
    %7 = arith.maximumf %5, %6 : vector<32x128xf32>
    %8 = arith.truncf %7 : vector<32x128xf32> to vector<32x128xbf16>
    %c0_6 = arith.constant 0 : index
    %c0_7 = arith.constant 0 : index
    %9 = vector.load %arg4[%c0_6, %c0_7] : memref<32x128xbf16, #tpu.memory_space<vmem>>, vector<32x128xbf16>
    tpu.vector_store %arg4[%c0_6, %c0_7], %8 {strides = array<i32>} : memref<32x128xbf16, #tpu.memory_space<vmem>>, vector<32x128xbf16>,
    return
  }
  func.func @transform_0(%arg0: i32) -> (i32, i32) {
    %c0_i32 = arith.constant 0 : i32
    %c0_i32_0 = arith.constant 0 : i32
    %c0_i32_1 = arith.constant 0 : i32
    return %c0_i32, %c0_i32_0 : i32, i32
  }
  func.func @transform_1(%arg0: i32) -> (i32, i32) {
    %c0_i32 = arith.constant 0 : i32
    %c0_i32_0 = arith.constant 0 : i32
    return %c0_i32, %arg0 : i32, i32
  }
  func.func @transform_2(%arg0: i32) -> (i32, i32) {
    %c0_i32 = arith.constant 0 : i32
    %c0_i32_0 = arith.constant 0 : i32
    %c0_i32_1 = arith.constant 0 : i32
    return %c0_i32, %c0_i32_0 : i32, i32
  }
  func.func @transform_3(%arg0: i32) -> (i32, i32) {
    %c0_i32 = arith.constant 0 : i32
    %c0_i32_0 = arith.constant 0 : i32
    return %c0_i32, %arg0 : i32, i32
  }
}

module attributes {stable_mosaic.version = 11 : i64} {
  func.func @_conv_matmul_kernel(%arg0: i32, %arg1: memref<64x512xbf16, #tpu.memory_space<vmem>>, %arg2: memref<512x18xbf16, #tpu.memory_space<vmem>>, %arg3: memref<64x1xf32, #tpu.memory_space<vmem>>, %arg4: memref<64x18xbf16, #tpu.memory_space<vmem>>) attributes {dimension_semantics = [#tpu.dimension_semantics<parallel>], iteration_bounds = array<i64: 1>, scalar_prefetch = 0 : i64, scratch_operands = 0 : i64, tpu.core_type = #tpu.core_type<tc>, window_params = [{pipeline_mode = #tpu.pipeline_mode<synchronous>, transform_indices = @transform_0, window_bounds = array<i64: 64, 512>}, {transform_indices = @transform_1, window_bounds = array<i64: 512, 18>}, {pipeline_mode = #tpu.pipeline_mode<synchronous>, transform_indices = @transform_2, window_bounds = array<i64: 64, 1>}, {transform_indices = @transform_3, window_bounds = array<i64: 64, 18>}]} {
    %c0 = arith.constant 0 : index
    %c0_0 = arith.constant 0 : index
    %0 = vector.load %arg1[%c0, %c0_0] : memref<64x512xbf16, #tpu.memory_space<vmem>>, vector<64x512xbf16>
    %c0_1 = arith.constant 0 : index
    %c0_2 = arith.constant 0 : index
    %1 = vector.load %arg2[%c0_1, %c0_2] : memref<512x18xbf16, #tpu.memory_space<vmem>>, vector<512x18xbf16>
    %cst = arith.constant dense<0.000000e+00> : vector<64x18xf32>
    %2 = tpu.matmul %0, %1, %cst {dimension_numbers = #tpu.dot_dimension_numbers<[1], [0], [0], [1], [0, 0, 1, 1], [], []>} : vector<64x512xbf16>, vector<512x18xbf16>, vector<64x18xf32> -> vector<64x18xf32>
    %c0_3 = arith.constant 0 : index
    %c0_4 = arith.constant 0 : index
    %3 = vector.load %arg3[%c0_3, %c0_4] : memref<64x1xf32, #tpu.memory_space<vmem>>, vector<64x1xf32>
    %4 = vector.broadcast %3 : vector<64x1xf32> to vector<64x18xf32>
    %5 = arith.addf %2, %4 : vector<64x18xf32>
    %cst_5 = arith.constant 0.000000e+00 : f32
    %6 = vector.broadcast %cst_5 : f32 to vector<64x18xf32>
    %7 = arith.maximumf %5, %6 : vector<64x18xf32>
    %8 = arith.truncf %7 : vector<64x18xf32> to vector<64x18xbf16>
    %c0_6 = arith.constant 0 : index
    %c0_7 = arith.constant 0 : index
    %9 = vector.load %arg4[%c0_6, %c0_7] : memref<64x18xbf16, #tpu.memory_space<vmem>>, vector<64x18xbf16>
    tpu.vector_store %arg4[%c0_6, %c0_7], %8 {strides = array<i32>} : memref<64x18xbf16, #tpu.memory_space<vmem>>, vector<64x18xbf16>,
    return
  }
  func.func @transform_0(%arg0: i32) -> (i32, i32) {
    %c0_i32 = arith.constant 0 : i32
    %c0_i32_0 = arith.constant 0 : i32
    %c0_i32_1 = arith.constant 0 : i32
    return %c0_i32, %c0_i32_0 : i32, i32
  }
  func.func @transform_1(%arg0: i32) -> (i32, i32) {
    %c0_i32 = arith.constant 0 : i32
    %c0_i32_0 = arith.constant 0 : i32
    return %c0_i32, %arg0 : i32, i32
  }
  func.func @transform_2(%arg0: i32) -> (i32, i32) {
    %c0_i32 = arith.constant 0 : i32
    %c0_i32_0 = arith.constant 0 : i32
    %c0_i32_1 = arith.constant 0 : i32
    return %c0_i32, %c0_i32_0 : i32, i32
  }
  func.func @transform_3(%arg0: i32) -> (i32, i32) {
    %c0_i32 = arith.constant 0 : i32
    %c0_i32_0 = arith.constant 0 : i32
    return %c0_i32, %arg0 : i32, i32
  }
}

module attributes {stable_mosaic.version = 11 : i64} {
  func.func @_mlp_head_kernel(%arg0: i32, %arg1: memref<64x2xbf16, #tpu.memory_space<vmem>>, %arg2: memref<32x64xbf16, #tpu.memory_space<vmem>>, %arg3: memref<32x1xf32, #tpu.memory_space<vmem>>, %arg4: memref<4x32xbf16, #tpu.memory_space<vmem>>, %arg5: memref<4x1xf32, #tpu.memory_space<vmem>>, %arg6: memref<4x2xf32, #tpu.memory_space<vmem>>) attributes {dimension_semantics = [#tpu.dimension_semantics<parallel>], iteration_bounds = array<i64: 1>, scalar_prefetch = 0 : i64, scratch_operands = 0 : i64, tpu.core_type = #tpu.core_type<tc>, window_params = [{transform_indices = @transform_0, window_bounds = array<i64: 64, 2>}, {pipeline_mode = #tpu.pipeline_mode<synchronous>, transform_indices = @transform_1, window_bounds = array<i64: 32, 64>}, {pipeline_mode = #tpu.pipeline_mode<synchronous>, transform_indices = @transform_2, window_bounds = array<i64: 32, 1>}, {pipeline_mode = #tpu.pipeline_mode<synchronous>, transform_indices = @transform_3, window_bounds = array<i64: 4, 32>}, {pipeline_mode = #tpu.pipeline_mode<synchronous>, transform_indices = @transform_4, window_bounds = array<i64: 4, 1>}, {transform_indices = @transform_5, window_bounds = array<i64: 4, 2>}]} {
    %c0 = arith.constant 0 : index
    %c0_0 = arith.constant 0 : index
    %0 = vector.load %arg2[%c0, %c0_0] : memref<32x64xbf16, #tpu.memory_space<vmem>>, vector<32x64xbf16>
    %c0_1 = arith.constant 0 : index
    %c0_2 = arith.constant 0 : index
    %1 = vector.load %arg1[%c0_1, %c0_2] : memref<64x2xbf16, #tpu.memory_space<vmem>>, vector<64x2xbf16>
    %cst = arith.constant dense<0.000000e+00> : vector<32x2xf32>
    %2 = tpu.matmul %0, %1, %cst {dimension_numbers = #tpu.dot_dimension_numbers<[1], [0], [0], [1], [0, 0, 1, 1], [], []>} : vector<32x64xbf16>, vector<64x2xbf16>, vector<32x2xf32> -> vector<32x2xf32>
    %c0_3 = arith.constant 0 : index
    %c0_4 = arith.constant 0 : index
    %3 = vector.load %arg3[%c0_3, %c0_4] : memref<32x1xf32, #tpu.memory_space<vmem>>, vector<32x1xf32>
    %4 = vector.broadcast %3 : vector<32x1xf32> to vector<32x2xf32>
    %5 = arith.addf %2, %4 : vector<32x2xf32>
    %cst_5 = arith.constant 0.000000e+00 : f32
    %6 = vector.broadcast %cst_5 : f32 to vector<32x2xf32>
    %7 = arith.maximumf %5, %6 : vector<32x2xf32>
    %c0_6 = arith.constant 0 : index
    %c0_7 = arith.constant 0 : index
    %8 = vector.load %arg4[%c0_6, %c0_7] : memref<4x32xbf16, #tpu.memory_space<vmem>>, vector<4x32xbf16>
    %9 = arith.truncf %7 : vector<32x2xf32> to vector<32x2xbf16>
    %cst_8 = arith.constant dense<0.000000e+00> : vector<4x2xf32>
    %10 = tpu.matmul %8, %9, %cst_8 {dimension_numbers = #tpu.dot_dimension_numbers<[1], [0], [0], [1], [0, 0, 1, 1], [], []>} : vector<4x32xbf16>, vector<32x2xbf16>, vector<4x2xf32> -> vector<4x2xf32>
    %c0_9 = arith.constant 0 : index
    %c0_10 = arith.constant 0 : index
    %11 = vector.load %arg5[%c0_9, %c0_10] : memref<4x1xf32, #tpu.memory_space<vmem>>, vector<4x1xf32>
    %12 = vector.broadcast %11 : vector<4x1xf32> to vector<4x2xf32>
    %13 = arith.addf %10, %12 : vector<4x2xf32>
    %c0_11 = arith.constant 0 : index
    %c0_12 = arith.constant 0 : index
    %14 = vector.load %arg6[%c0_11, %c0_12] : memref<4x2xf32, #tpu.memory_space<vmem>>, vector<4x2xf32>
    tpu.vector_store %arg6[%c0_11, %c0_12], %13 {strides = array<i32>} : memref<4x2xf32, #tpu.memory_space<vmem>>, vector<4x2xf32>,
    return
  }
  func.func @transform_0(%arg0: i32) -> (i32, i32) {
    %c0_i32 = arith.constant 0 : i32
    %c0_i32_0 = arith.constant 0 : i32
    return %c0_i32, %arg0 : i32, i32
  }
  func.func @transform_1(%arg0: i32) -> (i32, i32) {
    %c0_i32 = arith.constant 0 : i32
    %c0_i32_0 = arith.constant 0 : i32
    %c0_i32_1 = arith.constant 0 : i32
    return %c0_i32, %c0_i32_0 : i32, i32
  }
  func.func @transform_2(%arg0: i32) -> (i32, i32) {
    %c0_i32 = arith.constant 0 : i32
    %c0_i32_0 = arith.constant 0 : i32
    %c0_i32_1 = arith.constant 0 : i32
    return %c0_i32, %c0_i32_0 : i32, i32
  }
  func.func @transform_3(%arg0: i32) -> (i32, i32) {
    %c0_i32 = arith.constant 0 : i32
    %c0_i32_0 = arith.constant 0 : i32
    %c0_i32_1 = arith.constant 0 : i32
    return %c0_i32, %c0_i32_0 : i32, i32
  }
  func.func @transform_4(%arg0: i32) -> (i32, i32) {
    %c0_i32 = arith.constant 0 : i32
    %c0_i32_0 = arith.constant 0 : i32
    %c0_i32_1 = arith.constant 0 : i32
    return %c0_i32, %c0_i32_0 : i32, i32
  }
  func.func @transform_5(%arg0: i32) -> (i32, i32) {
    %c0_i32 = arith.constant 0 : i32
    %c0_i32_0 = arith.constant 0 : i32
    return %c0_i32, %arg0 : i32, i32
  }
}

module attributes {stable_mosaic.version = 11 : i64} {
  func.func @_conv_matmul_kernel(%arg0: i32, %arg1: memref<64x576xbf16, #tpu.memory_space<vmem>>, %arg2: memref<576x2xbf16, #tpu.memory_space<vmem>>, %arg3: memref<64x1xf32, #tpu.memory_space<vmem>>, %arg4: memref<64x2xbf16, #tpu.memory_space<vmem>>) attributes {dimension_semantics = [#tpu.dimension_semantics<parallel>], iteration_bounds = array<i64: 1>, scalar_prefetch = 0 : i64, scratch_operands = 0 : i64, tpu.core_type = #tpu.core_type<tc>, window_params = [{pipeline_mode = #tpu.pipeline_mode<synchronous>, transform_indices = @transform_0, window_bounds = array<i64: 64, 576>}, {transform_indices = @transform_1, window_bounds = array<i64: 576, 2>}, {pipeline_mode = #tpu.pipeline_mode<synchronous>, transform_indices = @transform_2, window_bounds = array<i64: 64, 1>}, {transform_indices = @transform_3, window_bounds = array<i64: 64, 2>}]} {
    %c0 = arith.constant 0 : index
    %c0_0 = arith.constant 0 : index
    %0 = vector.load %arg1[%c0, %c0_0] : memref<64x576xbf16, #tpu.memory_space<vmem>>, vector<64x576xbf16>
    %c0_1 = arith.constant 0 : index
    %c0_2 = arith.constant 0 : index
    %1 = vector.load %arg2[%c0_1, %c0_2] : memref<576x2xbf16, #tpu.memory_space<vmem>>, vector<576x2xbf16>
    %cst = arith.constant dense<0.000000e+00> : vector<64x2xf32>
    %2 = tpu.matmul %0, %1, %cst {dimension_numbers = #tpu.dot_dimension_numbers<[1], [0], [0], [1], [0, 0, 1, 1], [], []>} : vector<64x576xbf16>, vector<576x2xbf16>, vector<64x2xf32> -> vector<64x2xf32>
    %c0_3 = arith.constant 0 : index
    %c0_4 = arith.constant 0 : index
    %3 = vector.load %arg3[%c0_3, %c0_4] : memref<64x1xf32, #tpu.memory_space<vmem>>, vector<64x1xf32>
    %4 = vector.broadcast %3 : vector<64x1xf32> to vector<64x2xf32>
    %5 = arith.addf %2, %4 : vector<64x2xf32>
    %cst_5 = arith.constant 0.000000e+00 : f32
    %6 = vector.broadcast %cst_5 : f32 to vector<64x2xf32>
    %7 = arith.maximumf %5, %6 : vector<64x2xf32>
    %8 = arith.truncf %7 : vector<64x2xf32> to vector<64x2xbf16>
    %c0_6 = arith.constant 0 : index
    %c0_7 = arith.constant 0 : index
    %9 = vector.load %arg4[%c0_6, %c0_7] : memref<64x2xbf16, #tpu.memory_space<vmem>>, vector<64x2xbf16>
    tpu.vector_store %arg4[%c0_6, %c0_7], %8 {strides = array<i32>} : memref<64x2xbf16, #tpu.memory_space<vmem>>, vector<64x2xbf16>,
    return
  }
  func.func @transform_0(%arg0: i32) -> (i32, i32) {
    %c0_i32 = arith.constant 0 : i32
    %c0_i32_0 = arith.constant 0 : i32
    %c0_i32_1 = arith.constant 0 : i32
    return %c0_i32, %c0_i32_0 : i32, i32
  }
  func.func @transform_1(%arg0: i32) -> (i32, i32) {
    %c0_i32 = arith.constant 0 : i32
    %c0_i32_0 = arith.constant 0 : i32
    return %c0_i32, %arg0 : i32, i32
  }
  func.func @transform_2(%arg0: i32) -> (i32, i32) {
    %c0_i32 = arith.constant 0 : i32
    %c0_i32_0 = arith.constant 0 : i32
    %c0_i32_1 = arith.constant 0 : i32
    return %c0_i32, %c0_i32_0 : i32, i32
  }
  func.func @transform_3(%arg0: i32) -> (i32, i32) {
    %c0_i32 = arith.constant 0 : i32
    %c0_i32_0 = arith.constant 0 : i32
    return %c0_i32, %arg0 : i32, i32
  }
}

</mosaic_0001>

<bundles_post_ra>
// kernel: nature_cnn_forward.4
= control target key start
LH: loop header
LB: loop body
LE: loop exit
PB: predicated region body
PF: predicated region fallthrough
CT: control target
= control target key end

     0   :  { %v376_v1 = vmov 0   ;;  %s475_s1 = inlined_call_operand.vmem [shape: bf16[256,128], index: 1, kind: input, shape index: {}]   ;;  %s476_s0 = inlined_call_operand.vmem [shape: bf16[32,256], index: 0, kind: input, shape index: {}]   ;;  %s477_s2 = inlined_call_operand.vmem [shape: f32[32,1], index: 2, kind: input, shape index: {}]   ;;  %s478_s3 = inlined_call_operand.vmem [shape: bf16[32,128], index: 3, kind: output, shape index: {}]  }
   0x1   :  { %v354_v0 = vld [vmem:[%s475_s1 + $0x40] sm:$0xff]   ;;  %353 = vset.pattern.permute.xlu1 %v376_v1  ;;  %352 = vset.pattern.permute.xlu0 %v376_v1  ;;  %v356_v3 = vld [vmem:[%s475_s1 + $0x48] sm:$0xff]   ;;  %v358_v5 = vld [vmem:[%s475_s1 + $0x50] sm:$0xff]  }
   0x2   :  { %v355_v2 = vld [vmem:[%s475_s1] sm:$0xff]   ;;  %307 = vmatprep.subr.bf16.mxu0 %v354_v0  ;;  %335 = vmatprep.subr.bf16.mxu1 %v354_v0  ;;  %v357_v4 = vld [vmem:[%s475_s1 + $0x8] sm:$0xff]   ;;  %v359_v6 = vld [vmem:[%s475_s1 + $0x10] sm:$0xff]  }
   0x3   :  { %308 = vmatpush3.bf16.msra.mxu0 %v355_v2  ;;  %343 = vmatpush3.bf16.msra.mxu1 %v355_v2  ;;  %v360_v7 = vld [vmem:[%s475_s1 + $0x58] sm:$0xff]   ;;  %v362_v9 = vld [vmem:[%s475_s1 + $0x60] sm:$0xff]   ;;  %v364_v11 = vld [vmem:[%s475_s1 + $0x68] sm:$0xff]  }
   0x4   :  { %309 = vmatprep.subr.bf16.mxu0 %v356_v3  ;;  %336 = vmatprep.subr.bf16.mxu1 %v356_v3  ;;  %v361_v8 = vld [vmem:[%s475_s1 + $0x18] sm:$0xff]   ;;  %v363_v10 = vld [vmem:[%s475_s1 + $0x20] sm:$0xff]   ;;  %v365_v14 = vld [vmem:[%s475_s1 + $0x28] sm:$0xff]  }
   0x5   :  { %v372_v12 = vld [vmem:[%s476_s0 + $0x4] ss:$8 sps:$4 sm:$0xff]   ;;  %v375_v13 = vld [vmem:[%s476_s0 + $0x14] ss:$8 sps:$4 sm:$0xff]   ;;  %v370_v23 = vld [vmem:[%s476_s0] ss:$8 sps:$4 sm:$0xff]  }
   0x6   :  { %v53_v15 = vld [vmem:[%s477_s2 + $0x10] sm:$0xff]  ;;  %v51_v16 = vld [vmem:[%s477_s2] sm:$0xff]  ;;  %223 = vmatprep.mubr.bf16.mxu0 %v372_v12  ;;  %231 = vmatprep.mubr.bf16.mxu1 %v375_v13  ;;  %v54_v19 = vld [vmem:[%s477_s2 + $0x18] sm:$0xff] }
   0x7   :  { %310 = vmatpush3.bf16.msra.mxu0 %v357_v4  ;;  %344 = vmatpush3.bf16.msra.mxu1 %v357_v4  ;;  %v366_v17 = vld [vmem:[%s475_s1 + $0x70] sm:$0xff]   ;;  %v52_v20 = vld [vmem:[%s477_s2 + $0x8] sm:$0xff]  ;;  %v368_v21 = vld [vmem:[%s475_s1 + $0x78] sm:$0xff]  }
   0x8   :  { %311 = vmatprep.subr.bf16.mxu0 %v358_v5  ;;  %337 = vmatprep.subr.bf16.mxu1 %v358_v5  ;;  %v367_v18 = vld [vmem:[%s475_s1 + $0x30] sm:$0xff]   ;;  %v369_v22 = vld [vmem:[%s475_s1 + $0x38] sm:$0xff]  }
   0x9   :  { %67 = vperm.xlu1 %353, %v53_v15   ;;  %57 = vperm.xlu0 %352, %v51_v16   ;;  %v373_v24 = vld [vmem:[%s476_s0 + $0x10] ss:$8 sps:$4 sm:$0xff]  }
   0xb   :  { %312 = vmatpush3.bf16.msra.mxu0 %v359_v6  ;;  %345 = vmatpush3.bf16.msra.mxu1 %v359_v6 }
   0xc   :  { %313 = vmatprep.subr.bf16.mxu0 %v360_v7  ;;  %338 = vmatprep.subr.bf16.mxu1 %v360_v7 }
   0xd   :  { %72 = vperm.xlu1 %353, %v54_v19   ;;  %62 = vperm.xlu0 %352, %v52_v20  }
   0xf   :  { %314 = vmatpush3.bf16.msra.mxu0 %v361_v8  ;;  %346 = vmatpush3.bf16.msra.mxu1 %v361_v8 }
  0x10   :  { %315 = vmatprep.subr.bf16.mxu0 %v362_v9  ;;  %339 = vmatprep.subr.bf16.mxu1 %v362_v9 }
  0x13   :  { %316 = vmatpush3.bf16.msra.mxu0 %v363_v10  ;;  %347 = vmatpush3.bf16.msra.mxu1 %v363_v10 }
  0x14   :  { %317 = vmatprep.subr.bf16.mxu0 %v364_v11  ;;  %340 = vmatprep.subr.bf16.mxu1 %v364_v11 }
  0x17   :  { %318 = vmatpush3.bf16.msra.mxu0 %v365_v14  ;;  %348 = vmatpush3.bf16.msra.mxu1 %v365_v14 }
  0x18   :  { %319 = vmatprep.subr.bf16.mxu0 %v366_v17  ;;  %341 = vmatprep.subr.bf16.mxu1 %v366_v17 }
  0x1b   :  { %320 = vmatpush3.bf16.msra.mxu0 %v367_v18  ;;  %349 = vmatpush3.bf16.msra.mxu1 %v367_v18 }
  0x1c   :  { %321 = vmatprep.subr.bf16.mxu0 %v368_v21  ;;  %342 = vmatprep.subr.bf16.mxu1 %v368_v21 }
  0x1f   :  { %322 = vmatpush3.bf16.msra.mxu0 %v369_v22  ;;  %350 = vmatpush3.bf16.msra.mxu1 %v369_v22 }
  0x22   :  { %224 = vmatmul.mubr.bf16.vlgmr.msra.gmra.mrb[0].mxu0 %v370_v23  ;;  %232 = vmatmul.mubr.bf16.vlgmr.msra.gmra.mrb[0].mxu1 %v373_v24 }
  0x88   :  { %v68_v25 = vpop.permute.xlu1 %67  ;;  %v58_v26 = vpop.permute.xlu0 %57 }
  0x8c   :  { %v73_v41 = vpop.permute.xlu1 %72  ;;  %v63_v42 = vpop.permute.xlu0 %62 }
  0xf5   :  { %v323_v27 = vpop.f32.mrb[0].mxu0  ;;  %v329_v28 = vpop.f32.mrb[0].mxu1 }
  0xf6   :  { %v324_v29 = vpop.f32.mrb[1].mxu0  ;;  %v330_v30 = vpop.f32.mrb[1].mxu1 }
  0xf7   :  { %v325_v31 = vadd.f32 %v324_v29, %v323_v27  ;;  %v331_v32 = vadd.f32 %v330_v30, %v329_v28  ;;  %v326_v33 = vpop.f32.mrb[2].mxu0  ;;  %v332_v34 = vpop.f32.mrb[2].mxu1 }
  0xf8   :  { %v327_v35 = vpop.f32.mrb[3].mxu0  ;;  %v333_v36 = vpop.f32.mrb[3].mxu1 }
  0xf9   :  { %v226_v37 = vadd.f32 %v325_v31, %v58_v26  ;;  %v234_v38 = vadd.f32 %v331_v32, %v68_v25  ;;  %v328_v39 = vadd.f32 %v327_v35, %v326_v33  ;;  %v334_v40 = vadd.f32 %v333_v36, %v332_v34 }
  0xfb   :  { %v229_v43 = vadd.f32 %v328_v39, %v63_v42  ;;  %v237_v44 = vadd.f32 %v334_v40, %v73_v41  ;;  %v240_v45 = vmax.f32 %v226_v37, 0.0  ;;  %v242_v46 = vmax.f32 %v234_v38, 0.0 }
  0xfd   :  { %v241_v47 = vmax.f32 %v229_v43, 0.0  ;;  %v243_v48 = vmax.f32 %v237_v44, 0.0 }
  0xff   :  { %v299_v49 = vpack.c.bf16 %v241_v47, %v240_v45  ;;  %v304_v50 = vpack.c.bf16 %v243_v48, %v242_v46 }
 0x101   :  { %300 = vst [vmem:[%s478_s3] sm:$0xff] %v299_v49   ;;  %306 = vst [vmem:[%s478_s3 + $0x8] sm:$0xff] %v304_v50  }

// kernel: nature_cnn_forward.5
= control target key start
LH: loop header
LB: loop body
LE: loop exit
PB: predicated region body
PF: predicated region fallthrough
CT: control target
= control target key end

     0   :  { %v801_v1 = vmov 0   ;;  %vm585_vm0 = vcmask 142336   ;;  %s1022_s1 = inlined_call_operand.vmem [shape: bf16[512,18], index: 1, kind: input, shape index: {}]   ;;  %s1023_s0 = inlined_call_operand.vmem [shape: bf16[64,512], index: 0, kind: input, shape index: {}]   ;;  %s1024_s2 = inlined_call_operand.vmem [shape: f32[64,1], index: 2, kind: input, shape index: {}]   ;;  %s1025_s3 = inlined_call_operand.vmem [shape: bf16[64,18], index: 3, kind: output, shape index: {}]  }
   0x1   :  { %v745_v0 = vld [vmem:[%s1022_s1 + $0x40] sm:$0xff]   ;;  %743 = vset.pattern.permute.xlu0 %v801_v1  ;;  %744 = vset.pattern.permute.xlu1 %v801_v1  ;;  %v749_v5 = vld [vmem:[%s1022_s1 + $0x48] sm:$0xff]   ;;  %v753_v9 = vld [vmem:[%s1022_s1 + $0x50] sm:$0xff]  }
   0x2   :  { %v746_v2 = vld [vmem:[%s1022_s1 + $0xc0] sm:$0xff]   ;;  %662 = vmatprep.subr.bf16.mxu0 %v745_v0  ;;  %v750_v6 = vld [vmem:[%s1022_s1 + $0xc8] sm:$0xff]   ;;  %v754_v10 = vld [vmem:[%s1022_s1 + $0xd0] sm:$0xff]  }
   0x3   :  { %v747_v3 = vld [vmem:[%s1022_s1] sm:$0xff]   ;;  %702 = vmatprep.subr.bf16.mxu1 %v746_v2  ;;  %v751_v7 = vld [vmem:[%s1022_s1 + $0x8] sm:$0xff]   ;;  %v755_v11 = vld [vmem:[%s1022_s1 + $0x10] sm:$0xff]  }
   0x4   :  { %v748_v4 = vld [vmem:[%s1022_s1 + $0x80] sm:$0xff]   ;;  %663 = vmatpush3.bf16.msra.mxu0 %v747_v3  ;;  %v752_v8 = vld [vmem:[%s1022_s1 + $0x88] sm:$0xff]   ;;  %v756_v12 = vld [vmem:[%s1022_s1 + $0x90] sm:$0xff]  }
   0x5   :  { %703 = vmatpush3.bf16.msra.mxu1 %v748_v4  ;;  %664 = vmatprep.subr.bf16.mxu0 %v749_v5  ;;  %v757_v13 = vld [vmem:[%s1022_s1 + $0x58] sm:$0xff]   ;;  %v761_v17 = vld [vmem:[%s1022_s1 + $0x60] sm:$0xff]   ;;  %v765_v21 = vld [vmem:[%s1022_s1 + $0x68] sm:$0xff]  }
   0x6   :  { %704 = vmatprep.subr.bf16.mxu1 %v750_v6  ;;  %v758_v14 = vld [vmem:[%s1022_s1 + $0xd8] sm:$0xff]   ;;  %v762_v18 = vld [vmem:[%s1022_s1 + $0xe0] sm:$0xff]   ;;  %v766_v22 = vld [vmem:[%s1022_s1 + $0xe8] sm:$0xff]  }
   0x7   :  { %v759_v15 = vld [vmem:[%s1022_s1 + $0x18] sm:$0xff]   ;;  %v763_v19 = vld [vmem:[%s1022_s1 + $0x20] sm:$0xff]   ;;  %v767_v23 = vld [vmem:[%s1022_s1 + $0x28] sm:$0xff]  }
   0x8   :  { %665 = vmatpush3.bf16.msra.mxu0 %v751_v7  ;;  %v760_v16 = vld [vmem:[%s1022_s1 + $0x98] sm:$0xff]   ;;  %v764_v20 = vld [vmem:[%s1022_s1 + $0xa0] sm:$0xff]   ;;  %v768_v24 = vld [vmem:[%s1022_s1 + $0xa8] sm:$0xff]  }
   0x9   :  { %705 = vmatpush3.bf16.msra.mxu1 %v752_v8  ;;  %666 = vmatprep.subr.bf16.mxu0 %v753_v9  ;;  %v769_v25 = vld [vmem:[%s1022_s1 + $0x70] sm:$0xff]   ;;  %v773_v29 = vld [vmem:[%s1022_s1 + $0x78] sm:$0xff]   ;;  %v95_v43 = vld [vmem:[%s1024_s2] sm:$0xff] }
   0xa   :  { %706 = vmatprep.subr.bf16.mxu1 %v754_v10  ;;  %v770_v26 = vld [vmem:[%s1022_s1 + $0xf0] sm:$0xff]   ;;  %v774_v30 = vld [vmem:[%s1022_s1 + $0xf8] sm:$0xff]   ;;  %105 = vperm.xlu0 %743, %v95_v43   ;;  %v96_v45 = vld [vmem:[%s1024_s2 + $0x8] sm:$0xff] }
   0xb   :  { %v771_v27 = vld [vmem:[%s1022_s1 + $0x30] sm:$0xff]   ;;  %v775_v31 = vld [vmem:[%s1022_s1 + $0x38] sm:$0xff]   ;;  %v99_v48 = vld [vmem:[%s1024_s2 + $0x20] sm:$0xff] }
   0xc   :  { %667 = vmatpush3.bf16.msra.mxu0 %v755_v11  ;;  %v772_v28 = vld [vmem:[%s1022_s1 + $0xb0] sm:$0xff]   ;;  %v776_v32 = vld [vmem:[%s1022_s1 + $0xb8] sm:$0xff]   ;;  %v100_v51 = vld [vmem:[%s1024_s2 + $0x28] sm:$0xff] }
   0xd   :  { %707 = vmatpush3.bf16.msra.mxu1 %v756_v12  ;;  %668 = vmatprep.subr.bf16.mxu0 %v757_v13  ;;  %v777_v33 = vld [vmem:[%s1023_s0] ss:$16 sps:$4 sm:$0xff]   ;;  %v779_v34 = vld [vmem:[%s1023_s0 + $0x4] ss:$16 sps:$4 sm:$0xff]   ;;  %v780_v35 = vld [vmem:[%s1023_s0 + $0x8] ss:$16 sps:$4 sm:$0xff]  }
   0xe   :  { %708 = vmatprep.subr.bf16.mxu1 %v758_v14  ;;  %v782_v36 = vld [vmem:[%s1023_s0 + $0xc] ss:$16 sps:$4 sm:$0xff]   ;;  %447 = vmatprep.mubr.bf16.mxu0 %v779_v34  ;;  %v783_v37 = vld [vmem:[%s1023_s0 + $0x24] ss:$16 sps:$4 sm:$0xff]   ;;  %v787_v39 = vld [vmem:[%s1023_s0 + $0x20] ss:$16 sps:$4 sm:$0xff]  }
   0xf   :  { %512 = vmatprep.mubr.bf16.mxu1 %v782_v36  ;;  %v785_v38 = vld [vmem:[%s1023_s0 + $0x2c] ss:$16 sps:$4 sm:$0xff]   ;;  %v788_v40 = vld [vmem:[%s1023_s0 + $0x28] ss:$16 sps:$4 sm:$0xff]   ;;  %v789_v41 = vld [vmem:[%s1023_s0 + $0x44] ss:$16 sps:$4 sm:$0xff]   ;;  %110 = vperm.xlu0 %743, %v96_v45  }
  0x10   :  { %669 = vmatpush3.bf16.msra.mxu0 %v759_v15  ;;  %v791_v42 = vld [vmem:[%s1023_s0 + $0x4c] ss:$16 sps:$4 sm:$0xff]   ;;  %v97_v44 = vld [vmem:[%s1024_s2 + $0x10] sm:$0xff]  ;;  %v794_v49 = vld [vmem:[%s1023_s0 + $0x48] ss:$16 sps:$4 sm:$0xff]  }
  0x11   :  { %709 = vmatpush3.bf16.msra.mxu1 %v760_v16  ;;  %670 = vmatprep.subr.bf16.mxu0 %v761_v17  ;;  %v98_v46 = vld [vmem:[%s1024_s2 + $0x18] sm:$0xff]  ;;  %v793_v47 = vld [vmem:[%s1023_s0 + $0x40] ss:$16 sps:$4 sm:$0xff]   ;;  %v795_v50 = vld [vmem:[%s1023_s0 + $0x64] ss:$16 sps:$4 sm:$0xff]  }
  0x12   :  { %710 = vmatprep.subr.bf16.mxu1 %v762_v18  ;;  %115 = vperm.xlu1 %744, %v97_v44   ;;  %v797_v52 = vld [vmem:[%s1023_s0 + $0x6c] ss:$16 sps:$4 sm:$0xff]   ;;  %v101_v53 = vld [vmem:[%s1024_s2 + $0x30] sm:$0xff]  ;;  %v800_v56 = vld [vmem:[%s1023_s0 + $0x68] ss:$16 sps:$4 sm:$0xff]  }
  0x13   :  { %125 = vperm.xlu0 %743, %v99_v48   ;;  %v102_v54 = vld [vmem:[%s1024_s2 + $0x38] sm:$0xff]  ;;  %v799_v55 = vld [vmem:[%s1023_s0 + $0x60] ss:$16 sps:$4 sm:$0xff]  }
  0x14   :  { %671 = vmatpush3.bf16.msra.mxu0 %v763_v19 }
  0x15   :  { %711 = vmatpush3.bf16.msra.mxu1 %v764_v20  ;;  %672 = vmatprep.subr.bf16.mxu0 %v765_v21 }
  0x16   :  { %712 = vmatprep.subr.bf16.mxu1 %v766_v22  ;;  %120 = vperm.xlu1 %744, %v98_v46  }
  0x17   :  { %135 = vperm.xlu0 %743, %v101_v53  }
  0x18   :  { %673 = vmatpush3.bf16.msra.mxu0 %v767_v23 }
  0x19   :  { %713 = vmatpush3.bf16.msra.mxu1 %v768_v24  ;;  %674 = vmatprep.subr.bf16.mxu0 %v769_v25 }
  0x1a   :  { %714 = vmatprep.subr.bf16.mxu1 %v770_v26  ;;  %130 = vperm.xlu1 %744, %v100_v51  }
  0x1c   :  { %675 = vmatpush3.bf16.msra.mxu0 %v771_v27 }
  0x1d   :  { %715 = vmatpush3.bf16.msra.mxu1 %v772_v28  ;;  %676 = vmatprep.subr.bf16.mxu0 %v773_v29 }
  0x1e   :  { %716 = vmatprep.subr.bf16.mxu1 %v774_v30  ;;  %140 = vperm.xlu1 %744, %v102_v54  }
  0x20   :  { %677 = vmatpush3.bf16.msra.mxu0 %v775_v31 }
  0x21   :  { %717 = vmatpush3.bf16.msra.mxu1 %v776_v32 }
  0x23   :  { %448 = vmatmul.mubr.bf16.vlgmr.msra.gmra.mrb[0].mxu0 %v777_v33 }
  0x24   :  { %513 = vmatmul.mubr.bf16.vlgmr.msra.gmra.mrb[0].mxu1 %v780_v35  ;;  %455 = vmatprep.mubr.bf16.mxu0 %v783_v37 }
  0x25   :  { %520 = vmatprep.mubr.bf16.mxu1 %v785_v38 }
  0x2b   :  { %456 = vmatmul.mubr.bf16.gmra.mrb[4].mxu0 %v787_v39 }
  0x2c   :  { %521 = vmatmul.mubr.bf16.gmra.mrb[4].mxu1 %v788_v40  ;;  %463 = vmatprep.mubr.bf16.mxu0 %v789_v41 }
  0x2d   :  { %528 = vmatprep.mubr.bf16.mxu1 %v791_v42 }
  0x33   :  { %464 = vmatmul.mubr.bf16.gmra.mrb[8].mxu0 %v793_v47 }
  0x34   :  { %529 = vmatmul.mubr.bf16.gmra.mrb[8].mxu1 %v794_v49  ;;  %471 = vmatprep.mubr.bf16.mxu0 %v795_v50 }
  0x35   :  { %536 = vmatprep.mubr.bf16.mxu1 %v797_v52 }
  0x3b   :  { %472 = vmatmul.mubr.bf16.gmra.mrb[12].mxu0 %v799_v55 }
  0x3c   :  { %537 = vmatmul.mubr.bf16.gmra.mrb[12].mxu1 %v800_v56 }
  0x89   :  { %v106_v57 = vpop.permute.xlu0 %105 }
  0x8e   :  { %v111_v59 = vpop.permute.xlu0 %110 }
  0x91   :  { %v116_v10 = vpop.permute.xlu1 %115 }
  0x92   :  { %v126_v34 = vpop.permute.xlu0 %125 }
  0x95   :  { %v121_v28 = vpop.permute.xlu1 %120 }
  0x96   :  { %v136_v54 = vpop.permute.xlu0 %135 }
  0x99   :  { %v131_v50 = vpop.permute.xlu1 %130 }
  0xf6   :  { %v678_v58 = vpop.f32.mrb[0].mxu0 }
  0xf7   :  { %v718_v60 = vpop.f32.mrb[0].mxu1  ;;  %v679_v61 = vpop.f32.mrb[1].mxu0 }
  0xf8   :  { %v680_v62 = vadd.f32 %v679_v61, %v678_v58  ;;  %v719_v63 = vpop.f32.mrb[1].mxu1  ;;  %v681_v0 = vpop.f32.mrb[2].mxu0 }
  0xf9   :  { %v720_v1 = vadd.f32 %v719_v63, %v718_v60  ;;  %v721_v2 = vpop.f32.mrb[2].mxu1  ;;  %v682_v3 = vpop.f32.mrb[3].mxu0 }
  0xfa   :  { %v450_v4 = vadd.f32 %v680_v62, %v106_v57  ;;  %v683_v5 = vadd.f32 %v682_v3, %v681_v0  ;;  %v722_v6 = vpop.f32.mrb[3].mxu1 }
  0xfb   :  { %v723_v7 = vadd.f32 %v722_v6, %v721_v2 }
  0xfc   :  { %v515_v8 = vadd.f32 %v720_v1, %v450_v4  ;;  %v453_v9 = vadd.f32 %v683_v5, %v111_v59 }
  0xfe   :  { %v545_v11 = vmax.f32 %v515_v8, 0.0  ;;  %v518_v12 = vadd.f32 %v723_v7, %v453_v9  ;;  %v684_v13 = vpop.f32.mrb[4].mxu0  ;;  %v141_v8 = vpop.permute.xlu1 %140 }
  0xff   :  { %v724_v14 = vpop.f32.mrb[4].mxu1  ;;  %v685_v15 = vpop.f32.mrb[5].mxu0 }
 0x100   :  { %v654_v16 = vpack.c.bf16 %v545_v11, %v545_v11  ;;  %v546_v17 = vmax.f32 %v518_v12, 0.0  ;;  %v686_v18 = vadd.f32 %v685_v15, %v684_v13  ;;  %v725_v19 = vpop.f32.mrb[5].mxu1  ;;  %v687_v20 = vpop.f32.mrb[6].mxu0 }
 0x101   :  { %v726_v21 = vadd.f32 %v725_v19, %v724_v14  ;;  %v727_v22 = vpop.f32.mrb[6].mxu1  ;;  %v688_v23 = vpop.f32.mrb[7].mxu0 }
 0x102   :  { %586 = vst.msk [vmem:[%s1025_s3] sm:$0xf] %vm585_vm0, %v654_v16  ;;  %v655_v24 = vpack.c.bf16 %v546_v17, %v546_v17  ;;  %v458_v25 = vadd.f32 %v686_v18, %v116_v10  ;;  %v689_v26 = vadd.f32 %v688_v23, %v687_v20  ;;  %v728_v27 = vpop.f32.mrb[7].mxu1 }
 0x103   :  { %v729_v29 = vadd.f32 %v728_v27, %v727_v22 }
 0x104   :  { %587 = vst.msk [vmem:[%s1025_s3 + $0x4] sm:$0xf] %vm585_vm0, %v655_v24  ;;  %v523_v30 = vadd.f32 %v726_v21, %v458_v25  ;;  %v461_v31 = vadd.f32 %v689_v26, %v121_v28 }
 0x106   :  { %v547_v32 = vmax.f32 %v523_v30, 0.0  ;;  %v526_v33 = vadd.f32 %v729_v29, %v461_v31  ;;  %v690_v35 = vpop.f32.mrb[8].mxu0 }
 0x107   :  { %v730_v36 = vpop.f32.mrb[8].mxu1  ;;  %v691_v37 = vpop.f32.mrb[9].mxu0 }
 0x108   :  { %v656_v38 = vpack.c.bf16 %v547_v32, %v547_v32  ;;  %v548_v39 = vmax.f32 %v526_v33, 0.0  ;;  %v692_v40 = vadd.f32 %v691_v37, %v690_v35  ;;  %v731_v41 = vpop.f32.mrb[9].mxu1  ;;  %v693_v42 = vpop.f32.mrb[10].mxu0 }
 0x109   :  { %v732_v43 = vadd.f32 %v731_v41, %v730_v36  ;;  %v733_v44 = vpop.f32.mrb[10].mxu1  ;;  %v694_v45 = vpop.f32.mrb[11].mxu0 }
 0x10a   :  { %588 = vst.msk [vmem:[%s1025_s3 + $0x8] sm:$0xf] %vm585_vm0, %v656_v38  ;;  %v657_v46 = vpack.c.bf16 %v548_v39, %v548_v39  ;;  %v466_v47 = vadd.f32 %v692_v40, %v126_v34  ;;  %v695_v48 = vadd.f32 %v694_v45, %v693_v42  ;;  %v734_v49 = vpop.f32.mrb[11].mxu1 }
 0x10b   :  { %v735_v51 = vadd.f32 %v734_v49, %v733_v44 }
 0x10c   :  { %589 = vst.msk [vmem:[%s1025_s3 + $0xc] sm:$0xf] %vm585_vm0, %v657_v46  ;;  %v531_v52 = vadd.f32 %v732_v43, %v466_v47  ;;  %v469_v53 = vadd.f32 %v695_v48, %v131_v50 }
 0x10e   :  { %v549_v55 = vmax.f32 %v531_v52, 0.0  ;;  %v534_v56 = vadd.f32 %v735_v51, %v469_v53  ;;  %v696_v57 = vpop.f32.mrb[12].mxu0 }
 0x10f   :  { %v736_v58 = vpop.f32.mrb[12].mxu1  ;;  %v697_v59 = vpop.f32.mrb[13].mxu0 }
 0x110   :  { %v658_v60 = vpack.c.bf16 %v549_v55, %v549_v55  ;;  %v550_v61 = vmax.f32 %v534_v56, 0.0  ;;  %v698_v62 = vadd.f32 %v697_v59, %v696_v57  ;;  %v737_v63 = vpop.f32.mrb[13].mxu1  ;;  %v699_v0 = vpop.f32.mrb[14].mxu0 }
 0x111   :  { %v738_v1 = vadd.f32 %v737_v63, %v736_v58  ;;  %v739_v2 = vpop.f32.mrb[14].mxu1  ;;  %v700_v3 = vpop.f32.mrb[15].mxu0 }
 0x112   :  { %590 = vst.msk [vmem:[%s1025_s3 + $0x10] sm:$0xf] %vm585_vm0, %v658_v60  ;;  %v659_v4 = vpack.c.bf16 %v550_v61, %v550_v61  ;;  %v474_v5 = vadd.f32 %v698_v62, %v136_v54  ;;  %v701_v6 = vadd.f32 %v700_v3, %v699_v0  ;;  %v740_v7 = vpop.f32.mrb[15].mxu1 }
 0x113   :  { %v741_v9 = vadd.f32 %v740_v7, %v739_v2 }
 0x114   :  { %591 = vst.msk [vmem:[%s1025_s3 + $0x14] sm:$0xf] %vm585_vm0, %v659_v4  ;;  %v539_v10 = vadd.f32 %v738_v1, %v474_v5  ;;  %v477_v11 = vadd.f32 %v701_v6, %v141_v8 }
 0x116   :  { %v551_v12 = vmax.f32 %v539_v10, 0.0  ;;  %v542_v13 = vadd.f32 %v741_v9, %v477_v11 }
 0x118   :  { %v660_v14 = vpack.c.bf16 %v551_v12, %v551_v12  ;;  %v552_v15 = vmax.f32 %v542_v13, 0.0 }
 0x11a   :  { %592 = vst.msk [vmem:[%s1025_s3 + $0x18] sm:$0xf] %vm585_vm0, %v660_v14  ;;  %v661_v16 = vpack.c.bf16 %v552_v15, %v552_v15 }
 0x11c   :  { %593 = vst.msk [vmem:[%s1025_s3 + $0x1c] sm:$0xf] %vm585_vm0, %v661_v16 }

// kernel: nature_cnn_forward.7
= control target key start
LH: loop header
LB: loop body
LE: loop exit
PB: predicated region body
PF: predicated region fallthrough
CT: control target
= control target key end

     0   :  { %v259_v1 = vmov 0   ;;  %vm91_vm0 = vcmask 523264   ;;  %v260_v12 = vmov 0.0   ;;  %vm261_vm1 = vmmov 0   ;;  %s333_s0 = inlined_call_operand.vmem [shape: bf16[64,2], index: 0, kind: input, shape index: {}]   ;;  %s334_s1 = inlined_call_operand.vmem [shape: bf16[32,64], index: 1, kind: input, shape index: {}]   ;;  %s335_s2 = inlined_call_operand.vmem [shape: f32[32,1], index: 2, kind: input, shape index: {}]   ;;  %s336_s4 = inlined_call_operand.vmem [shape: f32[4,1], index: 4, kind: input, shape index: {}]   ;;  %s337_s3 = inlined_call_operand.vmem [shape: bf16[4,32], index: 3, kind: input, shape index: {}]   ;;  %s338_s5 = inlined_call_operand.vmem [shape: f32[4,2], index: 5, kind: output, shape index: {}]  }
   0x1   :  { %v253_v0 = vld [vmem:[%s333_s0] sm:$0xff]   ;;  %251 = vset.pattern.permute.xlu0 %v259_v1  ;;  %252 = vset.pattern.permute.xlu1 %v259_v1  ;;  %v254_v2 = vld [vmem:[%s333_s0 + $0x8] sm:$0xff]   ;;  %v255_v3 = vld [vmem:[%s333_s0 + $0x10] sm:$0xff]   ;;  %vm160_vm2 = vcmask 261120   ;;  %vm204_vm3 = vcmask 11264  }
   0x2   :  { %228 = vmatprep.subr.bf16.mxu0 %v253_v0  ;;  %v257_v4 = vld [vmem:[%s334_s1] sm:$0xff]   ;;  %v35_v6 = vld [vmem:[%s335_s2 + $0x10] sm:$0xff]  ;;  %v256_v7 = vld [vmem:[%s333_s0 + $0x18] sm:$0xff]   ;;  %240 = vmatprep.subr.bf16.mxu1 %v260_v12 }
   0x3   :  { %229 = vmatpush3.bf16.msra.mxu0 %v253_v0  ;;  %236 = vmatprep.mubr.msk.bf16.mxu0 %vm91_vm0, %v257_v4  ;;  %v33_v5 = vld [vmem:[%s335_s2] sm:$0xff]  ;;  %v34_v8 = vld [vmem:[%s335_s2 + $0x8] sm:$0xff]  ;;  %v36_v9 = vld [vmem:[%s335_s2 + $0x18] sm:$0xff] }
   0x4   :  { %230 = vmatprep.subr.bf16.mxu0 %v254_v2  ;;  %39 = vperm.xlu0 %251, %v33_v5   ;;  %v154_v10 = vld [vmem:[%s336_s4] sm:$0xf]  ;;  %v258_v11 = vld [vmem:[%s334_s1 + $0x8] sm:$0xff]  }
   0x5   :  { %49 = vperm.xlu1 %252, %v35_v6   ;;  %244 = vmatprep.mubr.msk.bf16.mxu1 %vm261_vm1, %v260_v12  ;;  %v151_v31 = vld [vmem:[%s337_s3] sm:$0x3] }
   0x7   :  { %231 = vmatpush3.bf16.msra.mxu0 %v254_v2 }
   0x8   :  { %232 = vmatprep.subr.bf16.mxu0 %v255_v3  ;;  %44 = vperm.xlu0 %251, %v34_v8  }
   0x9   :  { %54 = vperm.xlu1 %252, %v36_v9  }
   0xb   :  { %233 = vmatpush3.bf16.msra.mxu0 %v255_v3 }
   0xc   :  { %234 = vmatprep.subr.bf16.mxu0 %v256_v7  ;;  %157 = vperm.xlu0 %251, %v154_v10  }
   0xf   :  { %235 = vmatpush3.bf16.msra.mxu0 %v256_v7 }
  0x12   :  { %237 = vmatmul.mubr.msk.bf16.vlgmr.msra.gmra.mrb[0].mxu0 %vm91_vm0, %v258_v11 }
  0x83   :  { %v40_v14 = vpop.permute.xlu0 %39 }
  0x84   :  { %v50_v13 = vpop.permute.xlu1 %49 }
  0x87   :  { %v45_v21 = vpop.permute.xlu0 %44 }
  0x88   :  { %v55_v16 = vpop.permute.xlu1 %54 }
  0x8b   :  { %v158_v32 = vpop.permute.xlu0 %157 }
  0xe5   :  { %v238_v15 = vpop.f32.mrb[0].mxu0 }
  0xe6   :  { %v141_v17 = vadd.f32 %v238_v15, %v50_v13  ;;  %v132_v18 = vpop.f32.mrb[1].mxu0 }
  0xe7   :  { %v133_v19 = vadd.f32 %v132_v18, %v40_v14  ;;  %v239_v20 = vpop.f32.mrb[2].mxu0 }
  0xe8   :  { %v144_v22 = vadd.f32 %v239_v20, %v55_v16  ;;  %v135_v23 = vpop.f32.mrb[3].mxu0  ;;  %v149_v25 = vmax.f32 %v141_v17, 0.0 }
  0xe9   :  { %v136_v24 = vadd.f32 %v135_v23, %v45_v21  ;;  %v147_v27 = vmax.f32 %v133_v19, 0.0 }
  0xea   :  { %v150_v26 = vmax.f32 %v144_v22, 0.0 }
  0xeb   :  { %v148_v28 = vmax.f32 %v136_v24, 0.0 }
  0xec   :  { %v153_v29 = vpack.c.bf16 %v150_v26, %v149_v25 }
  0xed   :  { %v152_v30 = vpack.c.bf16 %v148_v28, %v147_v27 }
  0xef   :  { %241 = vmatpush3.bf16.msra.mxu1 %v152_v30 }
  0xf0   :  { %242 = vmatprep.subr.bf16.mxu1 %v260_v12 }
  0xf3   :  { %243 = vmatpush3.bf16.msra.mxu1 %v153_v29 }
  0xf6   :  { %245 = vmatmul.mubr.msk.bf16.vlgmr.msra.gmra.mrb[0].mxu1 %vm160_vm2, %v151_v31 }
 0x1c9   :  { %v198_v33 = vpop.f32.mrb[0].mxu1 }
 0x1ca   :  { %v199_v34 = vadd.f32 %v198_v33, %v158_v32  ;;  %v246_v35 = vpop.f32.mrb[1].mxu1 }
 0x1cb   :  { %v201_v36 = vpop.f32.mrb[2].mxu1 }
 0x1cc   :  { %205 = vst.msk [vmem:[%s338_s5] sm:$0xf] %vm204_vm3, %v199_v34  ;;  %v247_v37 = vpop.f32.mrb[3].mxu1 }

// kernel: nature_cnn_forward.6
= control target key start
LH: loop header
LB: loop body
LE: loop exit
PB: predicated region body
PF: predicated region fallthrough
CT: control target
= control target key end

     0   :  { %v991_v1 = vmov 0   ;;  %vm475_vm0 = vcmask 523264   ;;  %vm723_vm1 = vcmask 11264   ;;  %s1243_s1 = inlined_call_operand.vmem [shape: bf16[576,2], index: 1, kind: input, shape index: {}]   ;;  %s1244_s0 = inlined_call_operand.vmem [shape: bf16[64,576], index: 0, kind: input, shape index: {}]   ;;  %s1245_s2 = inlined_call_operand.vmem [shape: f32[64,1], index: 2, kind: input, shape index: {}]   ;;  %s1246_s3 = inlined_call_operand.vmem [shape: bf16[64,2], index: 3, kind: output, shape index: {}]  }
   0x1   :  { %v927_v0 = vld [vmem:[%s1243_s1 + $0x40] sm:$0xff]   ;;  %925 = vset.pattern.permute.xlu0 %v991_v1  ;;  %926 = vset.pattern.permute.xlu1 %v991_v1  ;;  %v931_v5 = vld [vmem:[%s1243_s1 + $0x48] sm:$0xff]   ;;  %v935_v9 = vld [vmem:[%s1243_s1 + $0x50] sm:$0xff]  }
   0x2   :  { %v928_v2 = vld [vmem:[%s1243_s1 + $0xc0] sm:$0xff]   ;;  %812 = vmatprep.subr.bf16.mxu0 %v927_v0  ;;  %v932_v6 = vld [vmem:[%s1243_s1 + $0xc8] sm:$0xff]   ;;  %v936_v10 = vld [vmem:[%s1243_s1 + $0xd0] sm:$0xff]  }
   0x3   :  { %v929_v3 = vld [vmem:[%s1243_s1] sm:$0xff]   ;;  %852 = vmatprep.subr.bf16.mxu1 %v928_v2  ;;  %v933_v7 = vld [vmem:[%s1243_s1 + $0x8] sm:$0xff]   ;;  %v937_v11 = vld [vmem:[%s1243_s1 + $0x10] sm:$0xff]  }
   0x4   :  { %v930_v4 = vld [vmem:[%s1243_s1 + $0x80] sm:$0xff]   ;;  %813 = vmatpush3.bf16.msra.mxu0 %v929_v3  ;;  %v934_v8 = vld [vmem:[%s1243_s1 + $0x88] sm:$0xff]   ;;  %v938_v12 = vld [vmem:[%s1243_s1 + $0x90] sm:$0xff]  }
   0x5   :  { %853 = vmatpush3.bf16.msra.mxu1 %v930_v4  ;;  %814 = vmatprep.subr.bf16.mxu0 %v931_v5  ;;  %v939_v13 = vld [vmem:[%s1243_s1 + $0x58] sm:$0xff]   ;;  %v943_v17 = vld [vmem:[%s1243_s1 + $0x60] sm:$0xff]   ;;  %v947_v21 = vld [vmem:[%s1243_s1 + $0x68] sm:$0xff]  }
   0x6   :  { %854 = vmatprep.subr.bf16.mxu1 %v932_v6  ;;  %v940_v14 = vld [vmem:[%s1243_s1 + $0xd8] sm:$0xff]   ;;  %v944_v18 = vld [vmem:[%s1243_s1 + $0xe0] sm:$0xff]   ;;  %v948_v22 = vld [vmem:[%s1243_s1 + $0xe8] sm:$0xff]  }
   0x7   :  { %v941_v15 = vld [vmem:[%s1243_s1 + $0x18] sm:$0xff]   ;;  %v945_v19 = vld [vmem:[%s1243_s1 + $0x20] sm:$0xff]   ;;  %v949_v23 = vld [vmem:[%s1243_s1 + $0x28] sm:$0xff]  }
   0x8   :  { %815 = vmatpush3.bf16.msra.mxu0 %v933_v7  ;;  %v942_v16 = vld [vmem:[%s1243_s1 + $0x98] sm:$0xff]   ;;  %v946_v20 = vld [vmem:[%s1243_s1 + $0xa0] sm:$0xff]   ;;  %v950_v24 = vld [vmem:[%s1243_s1 + $0xa8] sm:$0xff]  }
   0x9   :  { %855 = vmatpush3.bf16.msra.mxu1 %v934_v8  ;;  %816 = vmatprep.subr.bf16.mxu0 %v935_v9  ;;  %v951_v25 = vld [vmem:[%s1243_s1 + $0x70] sm:$0xff]   ;;  %v955_v29 = vld [vmem:[%s1243_s1 + $0x78] sm:$0xff]   ;;  %v964_v36 = vld [vmem:[%s1244_s0 + $0xc] ss:$20 sps:$4 sm:$0xff]  }
   0xa   :  { %856 = vmatprep.subr.bf16.mxu1 %v936_v10  ;;  %v952_v26 = vld [vmem:[%s1243_s1 + $0xf0] sm:$0xff]   ;;  %v956_v30 = vld [vmem:[%s1243_s1 + $0xf8] sm:$0xff]   ;;  %v965_v37 = vld [vmem:[%s1243_s1 + $0x100] sm:$0xff]   ;;  %585 = vmatprep.mubr.bf16.mxu1 %v964_v36 }
   0xb   :  { %v953_v27 = vld [vmem:[%s1243_s1 + $0x30] sm:$0xff]   ;;  %v957_v31 = vld [vmem:[%s1243_s1 + $0x38] sm:$0xff]   ;;  %v966_v38 = vld [vmem:[%s1244_s0 + $0x2c] ss:$20 sps:$4 sm:$0xff]  }
   0xc   :  { %817 = vmatpush3.bf16.msra.mxu0 %v937_v11  ;;  %v954_v28 = vld [vmem:[%s1243_s1 + $0xb0] sm:$0xff]   ;;  %v958_v32 = vld [vmem:[%s1243_s1 + $0xb8] sm:$0xff]   ;;  %v972_v40 = vld [vmem:[%s1243_s1 + $0x108] sm:$0xff]  }
   0xd   :  { %857 = vmatpush3.bf16.msra.mxu1 %v938_v12  ;;  %818 = vmatprep.subr.bf16.mxu0 %v939_v13  ;;  %v959_v33 = vld [vmem:[%s1244_s0] ss:$20 sps:$4 sm:$0xff]   ;;  %v961_v34 = vld [vmem:[%s1244_s0 + $0x4] ss:$20 sps:$4 sm:$0xff]   ;;  %v962_v35 = vld [vmem:[%s1244_s0 + $0x8] ss:$20 sps:$4 sm:$0xff]  }
   0xe   :  { %858 = vmatprep.subr.bf16.mxu1 %v940_v14  ;;  %520 = vmatprep.mubr.bf16.mxu0 %v961_v34  ;;  %v968_v39 = vld [vmem:[%s1244_s0 + $0x34] ss:$20 sps:$4 sm:$0xff]   ;;  %v971_v42 = vld [vmem:[%s1244_s0 + $0x30] ss:$20 sps:$4 sm:$0xff]   ;;  %v986_v46 = vld [vmem:[%s1243_s1 + $0x118] sm:$0xff]  }
   0xf   :  { %v970_v41 = vld [vmem:[%s1244_s0 + $0x28] ss:$20 sps:$4 sm:$0xff]   ;;  %v979_v45 = vld [vmem:[%s1243_s1 + $0x110] sm:$0xff]   ;;  %v978_v48 = vld [vmem:[%s1244_s0 + $0x58] ss:$20 sps:$4 sm:$0xff]  }
  0x10   :  { %819 = vmatpush3.bf16.msra.mxu0 %v941_v15  ;;  %v973_v43 = vld [vmem:[%s1244_s0 + $0x54] ss:$20 sps:$4 sm:$0xff]   ;;  %v975_v44 = vld [vmem:[%s1244_s0 + $0x5c] ss:$20 sps:$4 sm:$0xff]   ;;  %v982_v50 = vld [vmem:[%s1244_s0 + $0x84] ss:$20 sps:$4 sm:$0xff]  }
  0x11   :  { %859 = vmatpush3.bf16.msra.mxu1 %v942_v16  ;;  %820 = vmatprep.subr.bf16.mxu0 %v943_v17  ;;  %v977_v47 = vld [vmem:[%s1244_s0 + $0x50] ss:$20 sps:$4 sm:$0xff]   ;;  %v112_v53 = vld [vmem:[%s1245_s2 + $0x8] sm:$0xff]  ;;  %v114_v54 = vld [vmem:[%s1245_s2 + $0x18] sm:$0xff] }
  0x12   :  { %860 = vmatprep.subr.bf16.mxu1 %v944_v18  ;;  %v980_v49 = vld [vmem:[%s1244_s0 + $0x7c] ss:$20 sps:$4 sm:$0xff]   ;;  %v111_v51 = vld [vmem:[%s1245_s2] sm:$0xff]  ;;  %v984_v55 = vld [vmem:[%s1244_s0 + $0x78] ss:$20 sps:$4 sm:$0xff]  }
  0x13   :  { %v113_v52 = vld [vmem:[%s1245_s2 + $0x10] sm:$0xff]  ;;  %121 = vperm.xlu0 %925, %v111_v51   ;;  %v115_v58 = vld [vmem:[%s1245_s2 + $0x20] sm:$0xff]  ;;  %v116_v60 = vld [vmem:[%s1245_s2 + $0x28] sm:$0xff] }
  0x14   :  { %821 = vmatpush3.bf16.msra.mxu0 %v945_v19  ;;  %131 = vperm.xlu1 %926, %v113_v52   ;;  %v985_v56 = vld [vmem:[%s1244_s0 + $0x80] ss:$20 sps:$4 sm:$0xff]   ;;  %v987_v57 = vld [vmem:[%s1244_s0 + $0x10] ss:$20 sps:$4 sm:$0xff]   ;;  %v118_v62 = vld [vmem:[%s1245_s2 + $0x38] sm:$0xff] }
  0x15   :  { %861 = vmatpush3.bf16.msra.mxu1 %v946_v20  ;;  %822 = vmatprep.subr.bf16.mxu0 %v947_v21  ;;  %v988_v59 = vld [vmem:[%s1244_s0 + $0x60] ss:$20 sps:$4 sm:$0xff]   ;;  %v989_v63 = vld [vmem:[%s1244_s0 + $0x38] ss:$20 sps:$4 sm:$0xff]   ;;  %v990_v0 = vld [vmem:[%s1244_s0 + $0x88] ss:$20 sps:$4 sm:$0xff]  }
  0x16   :  { %862 = vmatprep.subr.bf16.mxu1 %v948_v22  ;;  %v117_v61 = vld [vmem:[%s1245_s2 + $0x30] sm:$0xff] }
  0x17   :  { %126 = vperm.xlu0 %925, %v112_v53  }
  0x18   :  { %823 = vmatpush3.bf16.msra.mxu0 %v949_v23  ;;  %136 = vperm.xlu1 %926, %v114_v54  }
  0x19   :  { %863 = vmatpush3.bf16.msra.mxu1 %v950_v24  ;;  %824 = vmatprep.subr.bf16.mxu0 %v951_v25 }
  0x1a   :  { %864 = vmatprep.subr.bf16.mxu1 %v952_v26 }
  0x1b   :  { %141 = vperm.xlu0 %925, %v115_v58  }
  0x1c   :  { %825 = vmatpush3.bf16.msra.mxu0 %v953_v27  ;;  %146 = vperm.xlu1 %926, %v116_v60  }
  0x1d   :  { %865 = vmatpush3.bf16.msra.mxu1 %v954_v28  ;;  %826 = vmatprep.subr.bf16.mxu0 %v955_v29 }
  0x1e   :  { %866 = vmatprep.subr.bf16.mxu1 %v956_v30 }
  0x1f   :  { %151 = vperm.xlu0 %925, %v117_v61  }
  0x20   :  { %827 = vmatpush3.bf16.msra.mxu0 %v957_v31  ;;  %156 = vperm.xlu1 %926, %v118_v62  }
  0x21   :  { %867 = vmatpush3.bf16.msra.mxu1 %v958_v32  ;;  %900 = vmatprep.subr.bf16.mxu0 %v965_v37 }
  0x22   :  { %916 = vmatprep.subr.bf16.mxu1 %v965_v37 }
  0x23   :  { %521 = vmatmul.mubr.bf16.vlgmr.msra.gmra.mrb[0].mxu0 %v959_v33 }
  0x24   :  { %586 = vmatmul.mubr.bf16.vlgmr.msra.gmra.mrb[0].mxu1 %v962_v35  ;;  %901 = vmatpush3.bf16.msra.mxu0 %v965_v37 }
  0x25   :  { %920 = vmatpush3.bf16.msra.mxu1 %v965_v37  ;;  %528 = vmatprep.mubr.bf16.mxu0 %v966_v38 }
  0x26   :  { %593 = vmatprep.mubr.bf16.mxu1 %v968_v39  ;;  %902 = vmatprep.subr.bf16.mxu0 %v972_v40 }
  0x27   :  { %917 = vmatprep.subr.bf16.mxu1 %v972_v40 }
  0x28   :  { %903 = vmatpush3.bf16.msra.mxu0 %v972_v40 }
  0x29   :  { %921 = vmatpush3.bf16.msra.mxu1 %v972_v40  ;;  %904 = vmatprep.subr.bf16.mxu0 %v979_v45 }
  0x2a   :  { %918 = vmatprep.subr.bf16.mxu1 %v979_v45 }
  0x2b   :  { %529 = vmatmul.mubr.bf16.gmra.mrb[4].mxu0 %v970_v41 }
  0x2c   :  { %594 = vmatmul.mubr.bf16.gmra.mrb[4].mxu1 %v971_v42  ;;  %536 = vmatprep.mubr.bf16.mxu0 %v973_v43 }
  0x2d   :  { %601 = vmatprep.mubr.bf16.mxu1 %v975_v44  ;;  %905 = vmatpush3.bf16.msra.mxu0 %v979_v45 }
  0x2e   :  { %922 = vmatpush3.bf16.msra.mxu1 %v979_v45  ;;  %906 = vmatprep.subr.bf16.mxu0 %v986_v46 }
  0x2f   :  { %919 = vmatprep.subr.bf16.mxu1 %v986_v46 }
  0x31   :  { %907 = vmatpush3.bf16.msra.mxu0 %v986_v46 }
  0x32   :  { %923 = vmatpush3.bf16.msra.mxu1 %v986_v46 }
  0x33   :  { %537 = vmatmul.mubr.bf16.gmra.mrb[8].mxu0 %v977_v47 }
  0x34   :  { %602 = vmatmul.mubr.bf16.gmra.mrb[8].mxu1 %v978_v48  ;;  %544 = vmatprep.mubr.bf16.mxu0 %v980_v49 }
  0x35   :  { %609 = vmatprep.mubr.bf16.mxu1 %v982_v50 }
  0x3b   :  { %545 = vmatmul.mubr.bf16.gmra.mrb[12].mxu0 %v984_v55 }
  0x3c   :  { %610 = vmatmul.mubr.bf16.gmra.mrb[12].mxu1 %v985_v56  ;;  %908 = vmatprep.mubr.msk.bf16.mxu0 %vm475_vm0, %v987_v57 }
  0x3d   :  { %912 = vmatprep.mubr.msk.bf16.mxu1 %vm475_vm0, %v988_v59 }
  0x43   :  { %909 = vmatmul.mubr.msk.bf16.vlgmr.msra.gmra.mrb[16].mxu0 %vm475_vm0, %v989_v63 }
  0x44   :  { %913 = vmatmul.mubr.msk.bf16.vlgmr.msra.gmra.mrb[16].mxu1 %vm475_vm0, %v990_v0 }
  0x92   :  { %v122_v1 = vpop.permute.xlu0 %121 }
  0x93   :  { %v132_v18 = vpop.permute.xlu1 %131 }
  0x96   :  { %v127_v3 = vpop.permute.xlu0 %126 }
  0x97   :  { %v137_v33 = vpop.permute.xlu1 %136 }
  0x9a   :  { %v142_v36 = vpop.permute.xlu0 %141 }
  0x9b   :  { %v147_v50 = vpop.permute.xlu1 %146 }
  0x9e   :  { %v152_v54 = vpop.permute.xlu0 %151 }
  0xf6   :  { %v828_v2 = vpop.f32.mrb[0].mxu0 }
  0xf7   :  { %v868_v4 = vpop.f32.mrb[0].mxu1  ;;  %v829_v5 = vpop.f32.mrb[1].mxu0 }
  0xf8   :  { %v830_v6 = vadd.f32 %v829_v5, %v828_v2  ;;  %v869_v7 = vpop.f32.mrb[1].mxu1  ;;  %v831_v8 = vpop.f32.mrb[2].mxu0 }
  0xf9   :  { %v870_v9 = vadd.f32 %v869_v7, %v868_v4  ;;  %v871_v10 = vpop.f32.mrb[2].mxu1  ;;  %v832_v11 = vpop.f32.mrb[3].mxu0 }
  0xfa   :  { %v523_v12 = vadd.f32 %v830_v6, %v122_v1  ;;  %v833_v13 = vadd.f32 %v832_v11, %v831_v8  ;;  %v872_v14 = vpop.f32.mrb[3].mxu1  ;;  %v157_v4 = vpop.permute.xlu1 %156 }
  0xfb   :  { %v873_v15 = vadd.f32 %v872_v14, %v871_v10 }
  0xfc   :  { %v526_v16 = vadd.f32 %v833_v13, %v127_v3  ;;  %v588_v17 = vadd.f32 %v870_v9, %v523_v12 }
  0xfe   :  { %v834_v19 = vpop.f32.mrb[4].mxu0  ;;  %v1208_v20 = vadd.f32 %v873_v15, %v526_v16 }
  0xff   :  { %v874_v21 = vpop.f32.mrb[4].mxu1  ;;  %v835_v22 = vpop.f32.mrb[5].mxu0 }
 0x100   :  { %v836_v23 = vadd.f32 %v835_v22, %v834_v19  ;;  %v875_v24 = vpop.f32.mrb[5].mxu1  ;;  %v837_v25 = vpop.f32.mrb[6].mxu0 }
 0x101   :  { %v876_v26 = vadd.f32 %v875_v24, %v874_v21  ;;  %v877_v27 = vpop.f32.mrb[6].mxu1  ;;  %v838_v28 = vpop.f32.mrb[7].mxu0 }
 0x102   :  { %v531_v29 = vadd.f32 %v836_v23, %v132_v18  ;;  %v839_v30 = vadd.f32 %v838_v28, %v837_v25  ;;  %v878_v31 = vpop.f32.mrb[7].mxu1 }
 0x103   :  { %v879_v32 = vadd.f32 %v878_v31, %v877_v27 }
 0x104   :  { %v534_v34 = vadd.f32 %v839_v30, %v137_v33  ;;  %v596_v35 = vadd.f32 %v876_v26, %v531_v29 }
 0x106   :  { %v840_v37 = vpop.f32.mrb[8].mxu0  ;;  %v599_v38 = vadd.f32 %v879_v32, %v534_v34 }
 0x107   :  { %v880_v39 = vpop.f32.mrb[8].mxu1  ;;  %v841_v40 = vpop.f32.mrb[9].mxu0 }
 0x108   :  { %v842_v41 = vadd.f32 %v841_v40, %v840_v37  ;;  %v881_v42 = vpop.f32.mrb[9].mxu1  ;;  %v843_v43 = vpop.f32.mrb[10].mxu0 }
 0x109   :  { %v882_v44 = vadd.f32 %v881_v42, %v880_v39  ;;  %v883_v45 = vpop.f32.mrb[10].mxu1  ;;  %v844_v46 = vpop.f32.mrb[11].mxu0 }
 0x10a   :  { %v539_v47 = vadd.f32 %v842_v41, %v142_v36  ;;  %v845_v48 = vadd.f32 %v844_v46, %v843_v43  ;;  %v884_v49 = vpop.f32.mrb[11].mxu1 }
 0x10b   :  { %v885_v51 = vadd.f32 %v884_v49, %v883_v45 }
 0x10c   :  { %v542_v52 = vadd.f32 %v845_v48, %v147_v50  ;;  %v604_v53 = vadd.f32 %v882_v44, %v539_v47 }
 0x10e   :  { %v846_v55 = vpop.f32.mrb[12].mxu0  ;;  %v607_v56 = vadd.f32 %v885_v51, %v542_v52 }
 0x10f   :  { %v886_v57 = vpop.f32.mrb[12].mxu1  ;;  %v847_v58 = vpop.f32.mrb[13].mxu0 }
 0x110   :  { %v848_v59 = vadd.f32 %v847_v58, %v846_v55  ;;  %v887_v60 = vpop.f32.mrb[13].mxu1  ;;  %v849_v61 = vpop.f32.mrb[14].mxu0 }
 0x111   :  { %v888_v62 = vadd.f32 %v887_v60, %v886_v57  ;;  %v889_v63 = vpop.f32.mrb[14].mxu1  ;;  %v850_v0 = vpop.f32.mrb[15].mxu0 }
 0x112   :  { %v547_v1 = vadd.f32 %v848_v59, %v152_v54  ;;  %v851_v2 = vadd.f32 %v850_v0, %v849_v61  ;;  %v890_v3 = vpop.f32.mrb[15].mxu1 }
 0x113   :  { %v891_v5 = vadd.f32 %v890_v3, %v889_v63 }
 0x114   :  { %v550_v6 = vadd.f32 %v851_v2, %v157_v4  ;;  %v612_v7 = vadd.f32 %v888_v62, %v547_v1 }
 0x116   :  { %v910_v8 = vpop.f32.mrb[16].mxu0  ;;  %v615_v9 = vadd.f32 %v891_v5, %v550_v6 }
 0x117   :  { %v661_v10 = vadd.f32 %v910_v8, %v596_v35  ;;  %v914_v11 = vpop.f32.mrb[16].mxu1  ;;  %v652_v12 = vpop.f32.mrb[17].mxu0 }
 0x118   :  { %v677_v13 = vadd.f32 %v914_v11, %v612_v7  ;;  %v653_v14 = vadd.f32 %v652_v12, %v588_v17  ;;  %v668_v15 = vpop.f32.mrb[17].mxu1  ;;  %v911_v16 = vpop.f32.mrb[18].mxu0 }
 0x119   :  { %v685_v18 = vmax.f32 %v661_v10, 0.0  ;;  %v669_v19 = vadd.f32 %v668_v15, %v604_v53  ;;  %v664_v21 = vadd.f32 %v911_v16, %v599_v38  ;;  %v915_v22 = vpop.f32.mrb[18].mxu1  ;;  %v655_v23 = vpop.f32.mrb[19].mxu0 }
 0x11a   :  { %v689_v24 = vmax.f32 %v677_v13, 0.0  ;;  %v683_v25 = vmax.f32 %v653_v14, 0.0  ;;  %v680_v26 = vadd.f32 %v915_v22, %v615_v9  ;;  %v656_v27 = vadd.f32 %v655_v23, %v1208_v20  ;;  %v671_v28 = vpop.f32.mrb[19].mxu1 }
 0x11b   :  { %v806_v29 = vpack.c.bf16 %v685_v18, %v685_v18  ;;  %v687_v30 = vmax.f32 %v669_v19, 0.0  ;;  %v686_v31 = vmax.f32 %v664_v21, 0.0  ;;  %v672_v32 = vadd.f32 %v671_v28, %v607_v56 }
 0x11c   :  { %v810_v33 = vpack.c.bf16 %v689_v24, %v689_v24  ;;  %v804_v17 = vpack.c.bf16 %v683_v25, %v683_v25  ;;  %v690_v34 = vmax.f32 %v680_v26, 0.0  ;;  %v684_v35 = vmax.f32 %v656_v27, 0.0 }
 0x11d   :  { %726 = vst.msk [vmem:[%s1246_s3 + $0x8] sm:$0xf] %vm723_vm1, %v806_v29  ;;  %v808_v36 = vpack.c.bf16 %v687_v30, %v687_v30  ;;  %v807_v37 = vpack.c.bf16 %v686_v31, %v686_v31  ;;  %v688_v38 = vmax.f32 %v672_v32, 0.0 }
 0x11e   :  { %730 = vst.msk [vmem:[%s1246_s3 + $0x18] sm:$0xf] %vm723_vm1, %v810_v33  ;;  %724 = vst.msk [vmem:[%s1246_s3] sm:$0xf] %vm723_vm1, %v804_v17  ;;  %v811_v20 = vpack.c.bf16 %v690_v34, %v690_v34  ;;  %v805_v39 = vpack.c.bf16 %v684_v35, %v684_v35 }
 0x11f   :  { %728 = vst.msk [vmem:[%s1246_s3 + $0x10] sm:$0xf] %vm723_vm1, %v808_v36  ;;  %727 = vst.msk [vmem:[%s1246_s3 + $0xc] sm:$0xf] %vm723_vm1, %v807_v37  ;;  %v809_v40 = vpack.c.bf16 %v688_v38, %v688_v38 }
 0x120   :  { %731 = vst.msk [vmem:[%s1246_s3 + $0x1c] sm:$0xf] %vm723_vm1, %v811_v20  ;;  %725 = vst.msk [vmem:[%s1246_s3 + $0x4] sm:$0xf] %vm723_vm1, %v805_v39 }
 0x121   :  { %729 = vst.msk [vmem:[%s1246_s3 + $0x14] sm:$0xf] %vm723_vm1, %v809_v40 }

</bundles_post_ra>
